<compile_context>
chip_gen: v5e
topology: v5e:2x2
jax: 0.10.0
libtpu: 0.0.40
codegen_flags: <defaults>
</compile_context>

<pallas_src>
import math
import functools

import numpy as np

import jax
import jax.numpy as jnp
from jax import lax
from jax.experimental import pallas as pl
from jax.experimental.pallas import tpu as pltpu


# ----------------------------------------------------------------------------
# helpers from the reference module
# ----------------------------------------------------------------------------
def str2int(strs):
    return [ord(ch) % 128 for ch in strs]


# ----------------------------------------------------------------------------
# small dense Pallas kernels
# ----------------------------------------------------------------------------
def _linear_kernel(x_ref, w_ref, b_ref, o_ref):
    o_ref[...] = (jnp.dot(x_ref[...], w_ref[...],
                          preferred_element_type=jnp.float32) + b_ref[...])


@jax.jit
def pallas_linear(x, w, b):
    # x: (M, K), w: (K, N), b: (1, N) -> (M, N); whole arrays in VMEM (tiny).
    M = x.shape[0]
    N = w.shape[1]
    return pl.pallas_call(
        _linear_kernel,
        out_shape=jax.ShapeDtypeStruct((M, N), jnp.float32),
    )(x, w, b)


def _regressor_kernel(x_ref, w1_ref, b1_ref, w2_ref, b2_ref, o_ref):
    h = jnp.dot(x_ref[...], w1_ref[...], preferred_element_type=jnp.float32) + b1_ref[...]
    h = jnp.maximum(h, 0.0)                                   # nn.ReLU
    o_ref[...] = jnp.dot(h, w2_ref[...], preferred_element_type=jnp.float32) + b2_ref[...]


@jax.jit
def pallas_regressor(x, w1, b1, w2, b2):
    M = x.shape[0]
    N = w2.shape[1]
    return pl.pallas_call(
        _regressor_kernel,
        out_shape=jax.ShapeDtypeStruct((M, N), jnp.float32),
    )(x, w1, b1, w2, b2)


# ----------------------------------------------------------------------------
# batched gated-conv string encoder
# ----------------------------------------------------------------------------
# The 3-tap filter/gate convs (16 output channels) are folded into three (C, 16*C) matmuls
# per gate (column = out_channel * C + char_channel), so the un-replicated (G, L+2, C) char
# embeddings are the only per-string data DMA'd.  8 strings per grid step; (8, 128)-dense
# output tile (sel padded to 128 columns).
_STR_GROUP = 8


@jax.jit
def _string_encoder_call(e_pad, msk, wf, bf, wg, bg, sel, bm):
    Npad, Lp, C = e_pad.shape
    L = Lp - 2
    G = _STR_GROUP

    def kernel(e_ref, m_ref, wf_ref, bf_ref, wg_ref, bg_ref, sel_ref, bm_ref, o_ref):
        rows = []
        for i in range(G):                                   # 8 strings per step, unrolled
            ep = e_ref[i]                                    # (L+2, C) zero padded rows
            e_prev = ep[0:L, :]
            e_cur = ep[1:L + 1, :]
            e_next = ep[2:L + 2, :]
            f = (jnp.dot(e_prev, wf_ref[0], preferred_element_type=jnp.float32)
                 + jnp.dot(e_cur, wf_ref[1], preferred_element_type=jnp.float32)
                 + jnp.dot(e_next, wf_ref[2], preferred_element_type=jnp.float32)
                 + bf_ref[...])
            g = (jnp.dot(e_prev, wg_ref[0], preferred_element_type=jnp.float32)
                 + jnp.dot(e_cur, wg_ref[1], preferred_element_type=jnp.float32)
                 + jnp.dot(e_next, wg_ref[2], preferred_element_type=jnp.float32)
                 + bg_ref[...])
            fg = jnp.tanh(f) * jax.nn.sigmoid(g)             # (L, 16*C)
            # masked mean over char positions (mask already carries 1/len)
            t = jnp.sum(fg * m_ref[i], axis=0, keepdims=True)            # (1, 16*C)
            rows.append(jnp.dot(t, sel_ref[...],
                                preferred_element_type=jnp.float32) + bm_ref[...])
        o_ref[...] = jnp.concatenate(rows, axis=0)           # lane-dense (8, 128) store

    def _rep(a):
        nd = a.ndim
        return pl.BlockSpec(a.shape, lambda i, _nd=nd: (0,) * _nd)

    return pl.pallas_call(
        kernel,
        out_shape=jax.ShapeDtypeStruct((Npad, 128), jnp.float32),
        grid=(Npad // G,),
        in_specs=[pl.BlockSpec((G, Lp, C), lambda i: (i, 0, 0)),
                  pl.BlockSpec((G, L, 1), lambda i: (i, 0, 0)),
                  _rep(wf), _rep(bf), _rep(wg), _rep(bg), _rep(sel), _rep(bm)],
        out_specs=pl.BlockSpec((G, 128), lambda i: (i, 0)),
        compiler_params=pltpu.CompilerParams(dimension_semantics=("parallel",)),
    )(e_pad, msk, wf, bf, wg, bg, sel, bm)


def encode_strings_batched(params, strings):
    C = params['c_dim']
    if len(strings) == 0:
        return jnp.zeros((0, C), jnp.float32)
    G = _STR_GROUP
    N = len(strings)
    Npad = -(-N // G) * G                                    # bucket string count to 8
    Lmax = max(len(s) for s in strings)
    L = -(-Lmax // 8) * 8                                    # bucket length (fewer recompiles)
    ids_np = np.zeros((Npad, L), np.int32)
    msk_np = np.zeros((Npad, L, 1), np.float32)
    for i, s in enumerate(strings):
        ids_np[i, :len(s)] = str2int(s)
        msk_np[i, :len(s), 0] = 1.0 / len(s)
    ids = jnp.asarray(ids_np)
    e = params['char_embedding'][ids]                        # (Npad, L, C)
    # nn.Embedding(max_norm=1): renorm looked-up rows to L2 norm <= 1
    nrm = jnp.sqrt(jnp.sum(e * e, axis=-1, keepdims=True))
    e = e * jnp.minimum(1.0, 1.0 / jnp.maximum(nrm, 1e-7))
    e = e * jnp.asarray((msk_np > 0).astype(np.float32))     # zero the padded positions
    e_pad = jnp.pad(e, ((0, 0), (1, 1), (0, 0)))             # Conv2d padding=(1,0)
    out = _string_encoder_call(e_pad, jnp.asarray(msk_np),
                               params['wf_mats'], params['bf_rep'],
                               params['wg_mats'], params['bg_rep'],
                               params['sel_pad'], params['bm_pad'])
    return out[:N, :C]


# ----------------------------------------------------------------------------
# fused 2-layer transformer encoder (post-norm, nhead=1, eval) + mean pooling
# ----------------------------------------------------------------------------
@functools.partial(jax.jit, static_argnames=('d_true',))
def _transformer_call(x, aux, row_seq, pool_rows, stack, *, d_true):
    n_groups, R, DP = x.shape
    gs = pool_rows.shape[0]
    n_layers = stack['wq'].shape[0]
    names = ('wq', 'wk', 'wv', 'wo', 'bq', 'bk', 'bv', 'bo',
             'w1', 'b1', 'w2', 'b2', 'ln1', 'ln2')
    weights = [stack[k] for k in names]
    scale = 1.0 / math.sqrt(d_true)
    inv_d = 1.0 / d_true

    def kernel(x_ref, aux_ref, rs_ref, pr_ref,
               wq_ref, wk_ref, wv_ref, wo_ref, bq_ref, bk_ref, bv_ref, bo_ref,
               w1_ref, b1_ref, w2_ref, b2_ref, ln1_ref, ln2_ref, o_ref):
        xr = x_ref[0]                                        # (R, 128), zero beyond d_true
        auxv = aux_ref[0]                                    # (4, R) per-column table
        col_seq = auxv[0:1, :]
        col_pos = auxv[1:2, :]
        lim = auxv[2:3, :]
        inv_lim = auxv[3:4, :]
        row_seq = rs_ref[...]                                # (R, 1)
        pool_rows_v = pr_ref[...]                            # (gs, 1)
        # block-diagonal additive mask + mean-pool weights built in-kernel (no R^2 DMA)
        col_ok = col_pos < lim                                               # (1, R)
        mask = jnp.where(jnp.logical_and(row_seq == col_seq, col_ok),
                         0.0, -1e9)                                          # (R, R)
        pool = jnp.where(jnp.logical_and(pool_rows_v == col_seq, col_ok),
                         inv_lim, 0.0)                                       # (gs, R)
        lane = (lax.broadcasted_iota(jnp.int32, (1, DP), 1) < d_true).astype(jnp.float32)

        for l in range(n_layers):                            # fused layers, unrolled
            # attention path: bf16 on the MXU, f32 accumulation / bias / softmax
            xb = xr.astype(jnp.bfloat16)
            q = jnp.dot(xb, wq_ref[l], preferred_element_type=jnp.float32) + bq_ref[l]
            k = jnp.dot(xb, wk_ref[l], preferred_element_type=jnp.float32) + bk_ref[l]
            v = jnp.dot(xb, wv_ref[l], preferred_element_type=jnp.float32) + bv_ref[l]
            s = lax.dot_general(q.astype(jnp.bfloat16), k.astype(jnp.bfloat16),
                                (((1,), (1,)), ((), ())),
                                preferred_element_type=jnp.float32) * scale + mask
            s = s - jnp.max(s, axis=-1, keepdims=True)
            p = jnp.exp(s)
            p = p * pl.reciprocal(jnp.sum(p, axis=-1, keepdims=True), approx=True)
            a = jnp.dot(p.astype(jnp.bfloat16), v.astype(jnp.bfloat16),
                        preferred_element_type=jnp.float32)
            a = jnp.dot(a.astype(jnp.bfloat16), wo_ref[l],
                        preferred_element_type=jnp.float32) + bo_ref[l]
            # residual + LayerNorm 1 (statistics over the true d_model lanes only)
            h = xr + a
            ln1 = ln1_ref[l]
            mu = jnp.sum(h, axis=-1, keepdims=True) * inv_d
            diff = (h - mu) * lane
            var = jnp.sum(diff * diff, axis=-1, keepdims=True) * inv_d
            h = diff * lax.rsqrt(var + 1e-5) * ln1[0:1, :] + ln1[1:2, :]
            # feed-forward: bf16 weights / activations on the MXU, f32 accumulate
            f = jnp.dot(h.astype(jnp.bfloat16), w1_ref[l],
                        preferred_element_type=jnp.float32) + b1_ref[l]
            f = jnp.maximum(f, 0.0)
            f = jnp.dot(f.astype(jnp.bfloat16), w2_ref[l],
                        preferred_element_type=jnp.float32) + b2_ref[l]
            # residual + LayerNorm 2
            h2 = h + f
            ln2 = ln2_ref[l]
            mu2 = jnp.sum(h2, axis=-1, keepdims=True) * inv_d
            diff2 = (h2 - mu2) * lane
            var2 = jnp.sum(diff2 * diff2, axis=-1, keepdims=True) * inv_d
            xr = diff2 * lax.rsqrt(var2 + 1e-5) * ln2[0:1, :] + ln2[1:2, :]
        # fused mean pooling over each sequence (weights built above carry 1/len)
        o_ref[0] = jnp.dot(pool, xr, preferred_element_type=jnp.float32)

    def _rep(a):
        nd = a.ndim
        return pl.BlockSpec(a.shape, lambda g, _nd=nd: (0,) * _nd)

    return pl.pallas_call(
        kernel,
        out_shape=jax.ShapeDtypeStruct((n_groups, gs, DP), jnp.float32),
        grid=(n_groups,),
        in_specs=[pl.BlockSpec((1, R, DP), lambda g: (g, 0, 0)),
                  pl.BlockSpec((1, 4, R), lambda g: (g, 0, 0)),
                  pl.BlockSpec((R, 1), lambda g: (0, 0)),
                  pl.BlockSpec((gs, 1), lambda g: (0, 0))]
                 + [_rep(w) for w in weights],
        out_specs=pl.BlockSpec((1, gs, DP), lambda g: (g, 0, 0)),
        compiler_params=pltpu.CompilerParams(
            dimension_semantics=("parallel",),
            vmem_limit_bytes=48 * 1024 * 1024),
    )(x, aux, row_seq, pool_rows, *weights)


def transformer_encode_pooled(seqs, attend_lens, stack, d_true, *, max_rows=256):
    """seqs: (n_seq, S, d_true) zero-padded sequences; attend_lens[p] = positions that
    sequence p attends to / is mean-pooled over (its call's max_length, as in the
    reference).  Returns (n_seq, d_true) pooled encodings."""
    n_seq, S, _ = seqs.shape
    DP = 128
    # bucket the per-sequence length to the next power of two (bounds recompiles)
    S_pad = 1 << max(1, (int(S) - 1).bit_length())
    # group size: keep R = gs * S_pad modest (bounds the R^2 score/exp waste and VMEM) and
    # guarantee >= 2 grid steps when possible (pipeline depth / both v7x TensorCores)
    gs = max(1, max_rows // S_pad)
    if n_seq >= 2:
        gs = min(gs, -(-n_seq // 2))
    gs = max(1, min(gs, max(n_seq, 1)))
    n_groups = -(-n_seq // gs)
    n_pad = n_groups * gs
    R = gs * S_pad

    x = jnp.pad(seqs.astype(jnp.float32),
                ((0, n_pad - n_seq), (0, S_pad - S), (0, DP - d_true)))
    x = x.reshape(n_groups, R, DP)

    # per-column table: sequence id, position, attend length, 1/attend-length (O(R) bytes)
    lens = [int(v) for v in attend_lens] + [int(S)] * (n_pad - n_seq)
    aux_np = np.zeros((n_groups, 4, R), np.float32)
    pos = np.arange(S_pad, dtype=np.float32)
    for g in range(n_groups):
        for i in range(gs):
            p = g * gs + i
            lo = i * S_pad
            aux_np[g, 0, lo:lo + S_pad] = i
            aux_np[g, 1, lo:lo + S_pad] = pos
            aux_np[g, 2, lo:lo + S_pad] = lens[p]
            aux_np[g, 3, lo:lo + S_pad] = 1.0 / lens[p]
    row_seq_np = np.repeat(np.arange(gs, dtype=np.float32), S_pad).reshape(R, 1)
    pool_rows_np = np.arange(gs, dtype=np.float32).reshape(gs, 1)

    out = _transformer_call(x, jnp.asarray(aux_np), jnp.asarray(row_seq_np),
                            jnp.asarray(pool_rows_np), stack, d_true=d_true)
    return out.reshape(n_pad, DP)[:n_seq, :d_true]


# ----------------------------------------------------------------------------
# parameter initialization (deterministic, synthetic)
# ----------------------------------------------------------------------------
def _uinit(key, shape, fan_in):
    bound = math.sqrt(1.5 / max(fan_in, 1))      # kaiming_uniform(a=sqrt(3))-style bound
    return jax.random.uniform(key, shape, jnp.float32, minval=-bound, maxval=bound)


def _make_layer(key, d_model, d_ff):
    ks = jax.random.split(key, 8)
    D, F = d_model, d_ff
    return dict(
        wq=_uinit(ks[0], (D, D), D), wk=_uinit(ks[1], (D, D), D),
        wv=_uinit(ks[2], (D, D), D), wo=_uinit(ks[3], (D, D), D),
        b_attn=_uinit(ks[4], (4, D), D),          # rows: bq, bk, bv, bo
        w1=_uinit(ks[5], (D, F), D), b1=_uinit(ks[6], (1, F), D),
        w2=_uinit(ks[7], (F, D), F), b2=jnp.zeros((1, D), jnp.float32),
        ln1=jnp.stack([jnp.ones((D,), jnp.float32), jnp.zeros((D,), jnp.float32)]),
        ln2=jnp.stack([jnp.ones((D,), jnp.float32), jnp.zeros((D,), jnp.float32)]),
    )


def _stack_pad_layers(layers, d, dp=128):
    """Stack both layers along a leading axis and zero-pad d_model to 128 lanes.
    All matmul weights (attention + FFN) are stored in bf16; biases / layernorm in f32."""
    def pad_dd(w):
        return jnp.pad(w, ((0, dp - d), (0, dp - d)))

    def pad_cols(w):
        return jnp.pad(w, ((0, 0), (0, dp - d)))

    def bias_row(l, r):
        return pad_cols(l['b_attn'][r:r + 1, :])

    return dict(
        wq=jnp.stack([pad_dd(l['wq']) for l in layers]).astype(jnp.bfloat16),
        wk=jnp.stack([pad_dd(l['wk']) for l in layers]).astype(jnp.bfloat16),
        wv=jnp.stack([pad_dd(l['wv']) for l in layers]).astype(jnp.bfloat16),
        wo=jnp.stack([pad_dd(l['wo']) for l in layers]).astype(jnp.bfloat16),
        bq=jnp.stack([bias_row(l, 0) for l in layers]),
        bk=jnp.stack([bias_row(l, 1) for l in layers]),
        bv=jnp.stack([bias_row(l, 2) for l in layers]),
        bo=jnp.stack([bias_row(l, 3) for l in layers]),
        w1=jnp.stack([jnp.pad(l['w1'], ((0, dp - d), (0, 0)))
                      for l in layers]).astype(jnp.bfloat16),
        b1=jnp.stack([l['b1'] for l in layers]),
        w2=jnp.stack([jnp.pad(l['w2'], ((0, 0), (0, dp - d)))
                      for l in layers]).astype(jnp.bfloat16),
        b2=jnp.stack([pad_cols(l['b2']) for l in layers]),
        ln1=jnp.stack([pad_cols(l['ln1']) for l in layers]),
        ln2=jnp.stack([pad_cols(l['ln2']) for l in layers]),
    )


def init_model(key, cfg):
    ks = jax.random.split(key, 18)
    C = cfg['char_embedding_size']
    KE = cfg['keyword_embedding_size']
    D2 = cfg['first_hidden_size'] + cfg['node_auxiliary_size']
    F_in = 2 * KE + 2 * cfg['second_hidden_size'] + 2 * cfg['other_size']
    F_in_pad = ((F_in + 127) // 128) * 128
    H_pad = 128
    OUT_pad = 128

    wf = _uinit(ks[2], (16, 3), 3); bf = _uinit(ks[3], (16, 1), 3)
    wg = _uinit(ks[4], (16, 3), 3); bg = _uinit(ks[5], (16, 1), 3)
    wm = _uinit(ks[6], (16, 1), 16); bm = _uinit(ks[7], (1, 1), 16)

    eye_c = jnp.eye(C, dtype=jnp.float32)
    # 3-tap gated conv folded into (C, 16*C) matmuls: column = out_channel * C + char_channel
    wf_mats = jnp.stack([jnp.kron(wf[:, t][None, :], eye_c) for t in range(3)])
    wg_mats = jnp.stack([jnp.kron(wg[:, t][None, :], eye_c) for t in range(3)])
    sel = jnp.kron(wm, eye_c)                                 # (16*C, C) folded 1x1 "mlp" conv
    sel_pad = jnp.pad(sel, ((0, 0), (0, 128 - C)))            # lane-dense output
    bm_pad = jnp.pad(bm, ((0, 0), (0, 128 - 1)))

    t1_layers = [_make_layer(ks[10], C, cfg['d_ff']), _make_layer(ks[11], C, cfg['d_ff'])]
    t2_layers = [_make_layer(ks[12], D2, cfg['d_ff']), _make_layer(ks[13], D2, cfg['d_ff'])]

    aline_w = _uinit(ks[8], (KE, C), KE)
    aline_b = _uinit(ks[9], (1, C), KE)

    reg_w1 = _uinit(ks[14], (F_in, 32), F_in)
    reg_b1 = _uinit(ks[15], (1, 32), F_in)
    reg_w2 = _uinit(ks[16], (32, 1), 32)
    reg_b2 = _uinit(ks[17], (1, 1), 32)

    return dict(
        keyword_embedding=_uinit(ks[0], (len(cfg['keywords']), KE), KE),
        char_embedding=_uinit(ks[1], (128, C), C),
        wf_mats=wf_mats, bf_rep=jnp.repeat(bf[:, 0], C)[None, :],
        wg_mats=wg_mats, bg_rep=jnp.repeat(bg[:, 0], C)[None, :],
        sel_pad=sel_pad, bm_pad=bm_pad,
        # keyword_aline padded to 128 output lanes (sliced back on host)
        aline_w=jnp.pad(aline_w, ((0, 0), (0, 128 - C))),
        aline_b=jnp.pad(aline_b, ((0, 0), (0, 128 - C))),
        t1=_stack_pad_layers(t1_layers, C), t1_d=C,
        t2=_stack_pad_layers(t2_layers, D2), t2_d=D2,
        # regressor, padded to lane-dense widths (extra rows/cols are zero => same result)
        reg_w1=jnp.pad(reg_w1, ((0, F_in_pad - F_in), (0, H_pad - 32))),
        reg_b1=jnp.pad(reg_b1, ((0, 0), (0, H_pad - 32))),
        reg_w2=jnp.pad(reg_w2, ((0, H_pad - 32), (0, OUT_pad - 1))),
        reg_b2=jnp.pad(reg_b2, ((0, 0), (0, OUT_pad - 1))),
        f_in=F_in, f_in_pad=F_in_pad, c_dim=C,
    )


# ----------------------------------------------------------------------------
# model forward (host orchestration of 5 batched Pallas calls)
# ----------------------------------------------------------------------------
def encoding_input(params, cfg, keys_list):
    ids = jnp.asarray([cfg['key2index'][k] for k in keys_list], jnp.int32)
    vec = params['keyword_embedding'][ids]
    return jnp.mean(vec, axis=0)


def keyword_aline_batched(params, kw_positions):
    C = params['c_dim']
    if len(kw_positions) == 0:
        return jnp.zeros((0, C), jnp.float32)
    n = len(kw_positions)
    n_pad = -(-n // 8) * 8
    idx_np = np.zeros((n_pad,), np.int32)
    idx_np[:n] = kw_positions
    emb = params['keyword_embedding'][jnp.asarray(idx_np)]
    out = pallas_linear(emb, params['aline_w'], params['aline_b'])     # (n_pad, 128)
    return out[:n, :C]


def forward(params, cfg, x):
    B = len(x)
    q_json_seq = [d[0] for d in x]
    q_static_seq = [d[1] for d in x]
    q_input_seq = [d[2] for d in x]
    mv_json_seq = [d[3] for d in x]
    mv_static_seq = [d[4] for d in x]
    mv_input_seq = [d[5] for d in x]
    other_seq = [d[6] for d in x]

    C = cfg['char_embedding_size']

    # -- pass 1: walk the ragged structure once; collect every keyword-aline and string
    #    request so each runs as a SINGLE batched Pallas call --
    calls = list(q_json_seq) + list(mv_json_seq)        # 2*B "encoding_seq" calls
    kw_positions, strings, call_nodes = [], [], []
    for seq in calls:
        nodes = []
        for node in seq:
            atts = []
            if isinstance(node, tuple):
                atts.append(('k', len(kw_positions)))
                kw_positions.append(cfg['key2index'][node[0]])
            else:
                if len(node) == 0:
                    # TODO(synk): reference uses (None, 1) which would KeyError; use keyword 0
                    node = [(cfg['keywords'][0], 1)]
                for att in node:
                    if att[1] == 1:
                        atts.append(('k', len(kw_positions)))
                        kw_positions.append(cfg['key2index'][att[0]])
                    else:
                        atts.append(('s', len(strings)))
                        strings.append(att[0])
            nodes.append(atts)
        call_nodes.append(nodes)

    # -- batched keyword_aline (one matmul) and batched string encoder (one call) --
    kw_vecs = keyword_aline_batched(params, kw_positions)
    str_vecs = encode_strings_batched(params, strings)
    n_kw = len(kw_positions)
    all_vecs = jnp.concatenate([kw_vecs, str_vecs, jnp.zeros((1, C), jnp.float32)], axis=0)
    zero_idx = all_vecs.shape[0] - 1

    # -- transformer1 over every node of every call in ONE fused 2-layer kernel --
    total_nodes = sum(len(n) for n in call_nodes)
    S1 = max(max(len(a) for a in nodes) for nodes in call_nodes)
    att_idx = np.full((total_nodes, S1), zero_idx, np.int32)
    attend1, call_ranges = [], []
    r = 0
    for nodes in call_nodes:
        call_max = max(len(a) for a in nodes)           # per-call max_length (ref semantics)
        start = r
        for atts in nodes:
            for j, (kind, pos) in enumerate(atts):
                att_idx[r, j] = pos if kind == 'k' else n_kw + pos
            attend1.append(call_max)
            r += 1
        call_ranges.append((start, r))
    node_in = all_vecs[jnp.asarray(att_idx)]            # (total_nodes, S1, C)
    node_vecs = transformer_encode_pooled(node_in, attend1, params['t1'], params['t1_d'])

    # -- transformer2: both branches (q and mv) batched in ONE fused 2-layer kernel --
    static_all = list(q_static_seq) + list(mv_static_seq)
    n_nodes_per_call = [e - s for (s, e) in call_ranges]
    q_max = max(n_nodes_per_call[:B])
    mv_max = max(n_nodes_per_call[B:])
    S2 = max(q_max, mv_max)
    seqs2, attend2 = [], []
    for ci, (s, e) in enumerate(call_ranges):
        enc = jnp.concatenate([node_vecs[s:e],
                               jnp.asarray(static_all[ci], jnp.float32)], axis=1)
        enc = jnp.pad(enc, ((0, S2 - (e - s)), (0, 0)))
        seqs2.append(enc)
        attend2.append(q_max if ci < B else mv_max)     # per-branch max_length (ref semantics)
    seq2 = jnp.stack(seqs2)                             # (2B, S2, first_hidden + aux)
    pooled2 = transformer_encode_pooled(seq2, attend2, params['t2'], params['t2_d'])
    q_real_out = pooled2[:B]
    mv_real_out = pooled2[B:]

    # -- keyword-bag encodings (trivial gather+mean, host jnp) and regressor --
    q_input = jnp.stack([encoding_input(params, cfg, v) for v in q_input_seq])
    mv_input = jnp.stack([encoding_input(params, cfg, v) for v in mv_input_seq])
    other = jnp.stack([jnp.asarray(o, jnp.float32) for o in other_seq])

    features = jnp.concatenate([q_input, q_real_out, mv_input, mv_real_out, other], axis=1)
    B_pad = -(-B // 8) * 8
    features = jnp.pad(features,
                       ((0, B_pad - B), (0, params['f_in_pad'] - params['f_in'])))
    out = pallas_regressor(features, params['reg_w1'], params['reg_b1'],
                           params['reg_w2'], params['reg_b2'])          # (B_pad, 128)
    return out[:B, 0]


# ----------------------------------------------------------------------------
# main
# ----------------------------------------------------------------------------
if __name__ == "__main__":
    keywords = ['scan', 'join', 'filter', 'sort', 'agg', 'hash', 'index', 'limit']
    cfg = dict(
        keywords=keywords,
        key2index={k: i for i, k in enumerate(keywords)},
        index2key={i: k for i, k in enumerate(keywords)},
        keyword_embedding_size=32,
        char_embedding_size=32,
        node_auxiliary_size=8,
        first_hidden_size=32,            # must equal char_embedding_size (as in reference)
        second_hidden_size=40,           # first_hidden_size + node_auxiliary_size
        other_size=4,
        drop_rate=0.1,
        usekeyword=True, usestring=True, usesequence=True, replacedquery=True,
        d_ff=2048,                       # nn.TransformerEncoderLayer default dim_feedforward
    )

    key = jax.random.PRNGKey(0)
    pkey, dkey = jax.random.split(key)
    params = init_model(pkey, cfg)

    k1, k2, k3, k4, k5, k6 = jax.random.split(dkey, 6)
    aux = cfg['node_auxiliary_size']
    OW = 2 * cfg['other_size']           # other_seq carries query+mv numericals

    # batch element 0
    elem0 = (
        [('scan',), [('join', 1), ('tbl_ordr', 2)], ('filter',), [('idx_col1', 2)]],
        jax.random.normal(k1, (4, aux), jnp.float32),
        ['scan', 'join', 'filter'],
        [('hash',), [('agg', 1)], [('mv_table1', 2), ('sort', 1)]],
        jax.random.normal(k2, (3, aux), jnp.float32),
        ['hash', 'agg'],
        jax.random.normal(k3, (OW,), jnp.float32),
    )
    # batch element 1
    elem1 = (
        [('sort',), [('limit', 1), ('col_name', 2)], ('index',)],
        jax.random.normal(k4, (3, aux), jnp.float32),
        ['sort', 'limit'],
        [('scan',), [('big_table99', 2)]],
        jax.random.normal(k5, (2, aux), jnp.float32),
        ['scan'],
        jax.random.normal(k6, (OW,), jnp.float32),
    )

    x = [elem0, elem1]
    out = forward(params, cfg, x)
    out = jax.block_until_ready(out)
    assert out.shape == (2,)
    print("KERNEL_OK")
</pallas_src>

<mosaic_0001>
module attributes {stable_mosaic.version = 11 : i64} {
  func.func @_linear_kernel(%arg0: memref<16x32xf32, #tpu.memory_space<vmem>>, %arg1: memref<32x128xf32, #tpu.memory_space<vmem>>, %arg2: memref<1x128xf32, #tpu.memory_space<vmem>>, %arg3: memref<16x128xf32, #tpu.memory_space<vmem>>) attributes {dimension_semantics = [], scalar_prefetch = 0 : i64, scratch_operands = 0 : i64, tpu.core_type = #tpu.core_type<tc>} {
    %c0 = arith.constant 0 : index
    %c0_0 = arith.constant 0 : index
    %0 = vector.load %arg0[%c0, %c0_0] : memref<16x32xf32, #tpu.memory_space<vmem>>, vector<16x32xf32>
    %c0_1 = arith.constant 0 : index
    %c0_2 = arith.constant 0 : index
    %1 = vector.load %arg1[%c0_1, %c0_2] : memref<32x128xf32, #tpu.memory_space<vmem>>, vector<32x128xf32>
    %cst = arith.constant dense<0.000000e+00> : vector<16x128xf32>
    %2 = tpu.matmul %0, %1, %cst {dimension_numbers = #tpu.dot_dimension_numbers<[1], [0], [0], [1], [0, 0, 1, 1], [], []>} : vector<16x32xf32>, vector<32x128xf32>, vector<16x128xf32> -> vector<16x128xf32>
    %c0_3 = arith.constant 0 : index
    %c0_4 = arith.constant 0 : index
    %3 = vector.load %arg2[%c0_3, %c0_4] : memref<1x128xf32, #tpu.memory_space<vmem>>, vector<1x128xf32>
    %4 = vector.broadcast %3 : vector<1x128xf32> to vector<16x128xf32>
    %5 = arith.addf %2, %4 : vector<16x128xf32>
    %c0_5 = arith.constant 0 : index
    %c0_6 = arith.constant 0 : index
    %6 = vector.load %arg3[%c0_5, %c0_6] : memref<16x128xf32, #tpu.memory_space<vmem>>, vector<16x128xf32>
    tpu.vector_store %arg3[%c0_5, %c0_6], %5 {strides = array<i32>} : memref<16x128xf32, #tpu.memory_space<vmem>>, vector<16x128xf32>,
    return
  }
}

</mosaic_0001>

<bundles_post_ra>
// kernel: pallas_linear.1
= control target key start
LH: loop header
LB: loop body
LE: loop exit
PB: predicated region body
PF: predicated region fallthrough
CT: control target
= control target key end

     0   :  { %8 = vsyncpa [#allocation3], 0  ;;  %s245_s0 = inlined_call_operand.hbm [shape: f32[16,32], index: 0, kind: input, shape index: {}]   ;;  %s246_s1 = inlined_call_operand.hbm [shape: f32[32,128], index: 1, kind: input, shape index: {}]   ;;  %s247_s2 = inlined_call_operand.vmem [shape: f32[1,128], index: 2, kind: input, shape index: {}]   ;;  %s248_s3 = inlined_call_operand.hbm [shape: f32[16,128], index: 3, kind: output, shape index: {}]  }
   0x1   :  { %9 = vsyncpa [#allocation6], 0 }
   0x2   :  { %10 = vsyncpa [#allocation4], 0  ;;  %s15_s14 = sshll.u32 %s245_s0, 4  ;;  %s199_s15 = smov [#allocation2]   ;;  %s16_s14 = int_to_ptr.hbm [resolvable:$true] %s15_s14 }
   0x3   :  { %s17_s16 = sshll.u32 %s199_s15, 4  ;;  %s28_s19 = sshll.u32 %s246_s1, 4  ;;  %s18_s16 = int_to_ptr.vmem [resolvable:$true] %s17_s16  ;;  %s29_s19 = int_to_ptr.hbm [resolvable:$true] %s28_s19 }
   0x4   :  { %s200_s20 = smov 128   ;;  %s201_s21 = smov 8  }
   0x5   :  { %23 = dma.hbm_to_vmem [thread:$0]  %s16_s14, 256, %s18_s16, [#allocation3], %s200_s20, %s200_s20, %s201_s21  }
   0x6   :  { %s202_s22 = smov [#allocation5]  }
   0x7   :  { %s30_s23 = sshll.u32 %s202_s22, 4  ;;  %s31_s23 = int_to_ptr.vmem [resolvable:$true] %s30_s23 }
   0x8   :  { %36 = dma.hbm_to_vmem [thread:$0]  %s29_s19, 512, %s31_s23, [#allocation6], %s200_s20, %s200_s20, %s201_s21  }
   0x9   :  { %193 = dma.done.wait [#allocation3], 256  }
   0xa   :  { %194 = vsyncadd [#allocation3], 4294967040 }
   0xb   :  { %195 = dma.done.wait [#allocation6], 512  }
   0xc   :  { %196 = vsyncadd [#allocation6], 4294966784  ;;  %v52_v0 = vld [vmem:[#allocation5 + $0x18] sm:$0xff]  ;;  %v51_v1 = vld [vmem:[#allocation5 + $0x10] sm:$0xff]  ;;  %vm57_vm0 = vcmask 261120   ;;  %s203_s24 = smov [#allocation7]  }
   0xd   :  { %76 = vmatpush.msra.mxu0 %v52_v0  ;;  %111 = vmatpush.msra.mxu1 %v52_v0  ;;  %v50_v2 = vld [vmem:[#allocation5 + $0x8] sm:$0xff]  ;;  %v49_v3 = vld [vmem:[#allocation5] sm:$0xff]  ;;  %v47_v4 = vld [vmem:[#allocation2] sm:$0xff]  ;;  %s93_s25 = sshll.u32 %s203_s24, 4  ;;  %s95_s28 = sshll.u32 %s248_s3, 4  ;;  %s94_s25 = int_to_ptr.vmem [resolvable:$true] %s93_s25  ;;  %s96_s28 = int_to_ptr.hbm [resolvable:$true] %s95_s28 }
   0xe   :  { %v48_v5 = vld [vmem:[#allocation2 + $0x8] sm:$0xff]  ;;  %v120_v6 = vld [vmem:[%s247_s2] ss:$0 sm:$0xff] }
   0xf   :  { %77 = vmatpush.msra.mxu0 %v51_v1  ;;  %112 = vmatpush.msra.mxu1 %v51_v1 }
  0x11   :  { %78 = vmatpush.msra.mxu0 %v50_v2  ;;  %113 = vmatpush.msra.mxu1 %v50_v2 }
  0x13   :  { %79 = vmatpush.msra.mxu0 %v49_v3  ;;  %114 = vmatpush.msra.mxu1 %v49_v3 }
  0x14   :  { %109 = vmatmul.msk.f32.vlgmr.msra.gmra.mxu0 %vm57_vm0, %v47_v4  ;;  %110 = vmatmul.msk.f32.vlgmr.msra.gmra.mxu1 %vm57_vm0, %v48_v5 }
  0x91   :  { %v81_v7 = vpop.f32.mrf.mxu0  ;;  %v84_v8 = vpop.f32.mrf.mxu1 }
  0x92   :  { %v82_v9 = vadd.f32 %v120_v6, %v81_v7  ;;  %v85_v10 = vadd.f32 %v120_v6, %v84_v8 }
  0x94   :  { %87 = vst [vmem:[#allocation7] sm:$0xff] %v82_v9 }
  0x95   :  { %88 = vst [vmem:[#allocation7 + $0x8] sm:$0xff] %v85_v10 }
  0x96   :  { %101 = dma.vmem_to_hbm [thread:$0]  %s94_s25, 256, %s96_s28, [#allocation4], %s200_s20, %s200_s20, %s201_s21  }
  0x97   :  { %197 = dma.done.wait [#allocation4], 256  }
  0x98   :  { %198 = vsyncadd [#allocation4], 4294967040 }
  0x99   :  { %106 = vsyncpa [#allocation3], 1 }
  0x9a   :  { %107 = vsyncpa [#allocation6], 1 }
  0x9b   :  { %108 = vsyncpa [#allocation4], 1 }

</bundles_post_ra>
